<compile_context>
chip_gen: v7x
topology: tpu7x:2x2x1
jax: 0.10.0
libtpu: 0.0.40
codegen_flags: <defaults>
</compile_context>

<pallas_src>
import functools

import jax
import jax.numpy as jnp
from jax import lax
from jax.experimental import pallas as pl
from jax.experimental.pallas import tpu as pltpu


# ----------------------------- Pallas kernel -----------------------------

def _yolo_loss_kernel(pred_ref, targ_ref, out_ref, *, S, B, C,
                      chunk_rows, n_chunks, lambda_coord, lambda_noobj):
    """pred_ref: (C+5B, block_rows, 128); targ_ref: (C+5, block_rows, 128);
    out_ref: (chunk_rows, 128) per-block partial per-cell loss sums."""
    f32 = jnp.float32
    s_f = f32(S)

    def per_cell_loss(rows):
        # ---- target features: dense (chunk_rows, 128) tiles ----
        t_x = targ_ref[C + 0, rows, :].astype(f32)
        t_y = targ_ref[C + 1, rows, :].astype(f32)
        t_w = targ_ref[C + 2, rows, :].astype(f32)
        t_h = targ_ref[C + 3, rows, :].astype(f32)
        t_conf = targ_ref[C + 4, rows, :].astype(f32)

        # Target box corners / area (w, h scaled by S) — shared by all B boxes.
        t_hw = t_w * (s_f * 0.5)
        t_hh = t_h * (s_f * 0.5)
        t_x1 = t_x - t_hw
        t_x2 = t_x + t_hw
        t_y1 = t_y - t_hh
        t_y2 = t_y + t_hh
        area_t = jnp.abs((t_x2 - t_x1) * (t_y2 - t_y1))

        # ---- per-box IoU + running best-box selection (no divide) ----
        best_inter = best_denom = None
        best_x = best_y = best_w = best_h = best_conf = None
        conf_sq_sum = None
        for b in range(B):
            base = C + 5 * b
            bx = pred_ref[base + 0, rows, :].astype(f32)
            by = pred_ref[base + 1, rows, :].astype(f32)
            bw = pred_ref[base + 2, rows, :].astype(f32)
            bh = pred_ref[base + 3, rows, :].astype(f32)
            bc = pred_ref[base + 4, rows, :].astype(f32)

            p_hw = bw * (s_f * 0.5)
            p_hh = bh * (s_f * 0.5)
            p_x1 = bx - p_hw
            p_x2 = bx + p_hw
            p_y1 = by - p_hh
            p_y2 = by + p_hh
            x1 = jnp.maximum(p_x1, t_x1)
            x2 = jnp.minimum(p_x2, t_x2)
            y1 = jnp.maximum(p_y1, t_y1)
            y2 = jnp.minimum(p_y2, t_y2)
            inter = jnp.maximum(x2 - x1, 0.0) * jnp.maximum(y2 - y1, 0.0)
            area_p = jnp.abs((p_x2 - p_x1) * (p_y2 - p_y1))
            denom = area_p + area_t - inter + 1e-6   # always > 0

            c_sq = bc * bc
            if b == 0:
                best_inter, best_denom = inter, denom
                best_x, best_y, best_w, best_h, best_conf = bx, by, bw, bh, bc
                conf_sq_sum = c_sq
            else:
                # iou_b > iou_best  <=>  inter*denom_best > inter_best*denom
                # (both denominators positive); strict > keeps first-index
                # tie-breaking like torch.argmax.
                better = inter * best_denom > best_inter * denom
                best_inter = jnp.where(better, inter, best_inter)
                best_denom = jnp.where(better, denom, best_denom)
                best_x = jnp.where(better, bx, best_x)
                best_y = jnp.where(better, by, best_y)
                best_w = jnp.where(better, bw, best_w)
                best_h = jnp.where(better, bh, best_h)
                best_conf = jnp.where(better, bc, best_conf)
                conf_sq_sum = conf_sq_sum + c_sq

        # ---- fused per-cell loss ----
        bw_c = jnp.maximum(best_w, 0.0)
        bh_c = jnp.maximum(best_h, 0.0)
        # (sqrt(a)-sqrt(b))^2 = a + b - 2*sqrt(a*b): 2 sqrts instead of 4.
        wh_sq = (t_w + bw_c - 2.0 * jnp.sqrt(t_w * bw_c)
                 + t_h + bh_c - 2.0 * jnp.sqrt(t_h * bh_c))
        coord_sq = (jnp.square(t_x - best_x) + jnp.square(t_y - best_y)
                    + wh_sq)

        cls_d = (targ_ref[0:C, rows, :].astype(f32)
                 - pred_ref[0:C, rows, :].astype(f32))
        cls_per_cell = jnp.sum(cls_d * cls_d, axis=0)     # (chunk_rows, 128)

        return (t_conf * (lambda_coord * coord_sq
                          + jnp.square(1.0 - best_conf)
                          + cls_per_cell)
                + lambda_noobj * (1.0 - t_conf) * conf_sq_sum)

    if n_chunks == 1:
        acc = per_cell_loss(pl.ds(0, chunk_rows))
    else:
        def body(ci, acc):
            r0 = pl.multiple_of(ci * chunk_rows, chunk_rows)
            return acc + per_cell_loss(pl.ds(r0, chunk_rows))
        acc = lax.fori_loop(0, n_chunks, body,
                            jnp.zeros((chunk_rows, 128), f32), unroll=True)

    # Per-block partial sums; padded cells contribute exactly 0 (t_conf == 0
    # and all padded box confidences == 0), so the wrapper-side sum is exact.
    out_ref[...] = acc


# ------------------------------- wrapper ----------------------------------

def yolo_loss_pallas(predictions, targets, *, S=7, B=2, C=80,
                     lambda_coord=5.0, lambda_noobj=0.5):
    n = predictions.shape[0]
    f_p = C + 5 * B
    f_t = C + 5
    m = n * S * S

    # Cell axis layout: rows of 128 lanes; blocks of <= 32 rows (4096 cells,
    # ~9-11 MiB double-buffered: fits v5e 16 MiB raised to 32 MiB, v6e/v7x 32
    # MiB scoped defaults); 8-row inner chunks keep live vregs within budget.
    r = -(-m // 128)
    if r <= 8:
        block_rows = r
        chunk_rows = r
    else:
        block_rows = min(((r + 7) // 8) * 8, 32)
        chunk_rows = 8
    num_blocks = -(-r // block_rows)
    r_pad = num_blocks * block_rows
    m_pad = r_pad * 128
    n_chunks = block_rows // chunk_rows

    # Feature-major, lane+sublane dense layout: (features, rows, 128 lanes).
    pred_fm = jnp.swapaxes(predictions.reshape(m, f_p), 0, 1)
    targ_fm = jnp.swapaxes(targets.reshape(m, f_t), 0, 1)
    if m_pad != m:
        pred_fm = jnp.pad(pred_fm, ((0, 0), (0, m_pad - m)))
        targ_fm = jnp.pad(targ_fm, ((0, 0), (0, m_pad - m)))
    pred_fm = pred_fm.reshape(f_p, r_pad, 128)
    targ_fm = targ_fm.reshape(f_t, r_pad, 128)

    kernel = functools.partial(_yolo_loss_kernel, S=S, B=B, C=C,
                               chunk_rows=chunk_rows, n_chunks=n_chunks,
                               lambda_coord=float(lambda_coord),
                               lambda_noobj=float(lambda_noobj))

    cost = pl.CostEstimate(
        flops=int(m_pad * (3 * C + 120)),
        transcendentals=int(2 * m_pad),
        bytes_accessed=int(4 * m_pad * (f_p + f_t)
                           + 4 * num_blocks * chunk_rows * 128),
    )

    partials = pl.pallas_call(
        kernel,
        out_shape=jax.ShapeDtypeStruct((num_blocks * chunk_rows, 128),
                                       jnp.float32),
        grid=(num_blocks,),
        in_specs=[
            pl.BlockSpec((f_p, block_rows, 128), lambda i: (0, i, 0)),
            pl.BlockSpec((f_t, block_rows, 128), lambda i: (0, i, 0)),
        ],
        out_specs=pl.BlockSpec((chunk_rows, 128), lambda i: (i, 0)),
        compiler_params=pltpu.CompilerParams(
            dimension_semantics=("parallel",),
            vmem_limit_bytes=32 * 1024 * 1024),
        cost_estimate=cost,
    )(pred_fm, targ_fm)

    # Tiny lane-dense partial array; reduce + batch-mean in JAX.
    return jnp.sum(partials) / jnp.float32(n)


# ------------------------- pure-JAX reference ----------------------------

def _iou_ref(b1, b2):
    b1x1 = b1[..., 0:1] - b1[..., 2:3] / 2
    b1y1 = b1[..., 1:2] - b1[..., 3:4] / 2
    b1x2 = b1[..., 0:1] + b1[..., 2:3] / 2
    b1y2 = b1[..., 1:2] + b1[..., 3:4] / 2
    b2x1 = b2[..., 0:1] - b2[..., 2:3] / 2
    b2y1 = b2[..., 1:2] - b2[..., 3:4] / 2
    b2x2 = b2[..., 0:1] + b2[..., 2:3] / 2
    b2y2 = b2[..., 1:2] + b2[..., 3:4] / 2
    x1 = jnp.maximum(b1x1, b2x1)
    y1 = jnp.maximum(b1y1, b2y1)
    x2 = jnp.minimum(b1x2, b2x2)
    y2 = jnp.minimum(b1y2, b2y2)
    inter = jnp.clip(x2 - x1, 0) * jnp.clip(y2 - y1, 0)
    a1 = jnp.abs((b1x2 - b1x1) * (b1y2 - b1y1))
    a2 = jnp.abs((b2x2 - b2x1) * (b2y2 - b2y1))
    return inter / (a1 + a2 - inter + 1e-6)


def yolo_loss_ref(pred, targ, S=7, B=2, C=80, lambda_coord=5.0, lambda_noobj=0.5):
    target_class = targ[..., :C]
    target_box = targ[..., C:C + 4]
    target_conf = targ[..., C + 4:C + 5]
    pred_class = pred[..., :C]
    pred_boxes = pred[..., C:].reshape(-1, S, S, B, 5)
    pb_coord = pred_boxes[..., :4]
    pb_conf = pred_boxes[..., 4:5]
    pb_coord_c = pb_coord.at[..., 2:].multiply(S)
    tb_c = target_box.at[..., 2:].multiply(S)
    tb_c = jnp.broadcast_to(tb_c[..., None, :], pb_coord.shape)
    iou = _iou_ref(pb_coord_c, tb_c)[..., 0]
    best = jnp.argmax(iou, axis=-1)
    best_coord = jnp.take_along_axis(pb_coord, best[..., None, None], axis=3)[..., 0, :]
    best_conf = jnp.take_along_axis(pb_conf, best[..., None, None], axis=3)[..., 0, :]
    coord_loss = jnp.sum(
        target_conf * (jnp.square(target_box[..., :2] - best_coord[..., :2])
                       + jnp.square(jnp.sqrt(target_box[..., 2:])
                                    - jnp.sqrt(jnp.maximum(best_coord[..., 2:], 0.0)))),
        axis=(1, 2, 3))
    obj_loss = jnp.sum(target_conf * jnp.square(1.0 - best_conf), axis=(1, 2, 3))
    noobj_loss = jnp.sum((1.0 - target_conf)[..., None, :] * jnp.square(pb_conf),
                         axis=(1, 2, 3, 4))
    cls_loss = jnp.sum(target_conf * jnp.square(target_class - pred_class),
                       axis=(1, 2, 3))
    total = lambda_coord * coord_loss + obj_loss + lambda_noobj * noobj_loss + cls_loss
    return jnp.mean(total)


# --------------------------------- main -----------------------------------

if __name__ == "__main__":
    S, B, C, N = 7, 2, 80, 2
    key = jax.random.PRNGKey(0)
    k_pred, k_tcls, k_tbox, k_tconf = jax.random.split(key, 4)

    # predictions: (N, S, S, C + 5B); may contain negative w/h (clamped in loss)
    predictions = jax.random.uniform(k_pred, (N, S, S, C + 5 * B),
                                     dtype=jnp.float32, minval=-0.2, maxval=1.0)
    # targets: (N, S, S, C + 5); box w/h kept non-negative (sqrt in loss)
    t_cls = jax.random.uniform(k_tcls, (N, S, S, C), dtype=jnp.float32)
    t_box = jax.random.uniform(k_tbox, (N, S, S, 4), dtype=jnp.float32,
                               minval=0.05, maxval=0.95)
    t_conf = (jax.random.uniform(k_tconf, (N, S, S, 1), dtype=jnp.float32)
              > 0.5).astype(jnp.float32)
    targets = jnp.concatenate([t_cls, t_box, t_conf], axis=-1)

    loss = yolo_loss_pallas(predictions, targets, S=S, B=B, C=C)
    loss = jax.block_until_ready(loss)

    ref = yolo_loss_ref(predictions, targets, S=S, B=B, C=C)
    assert jnp.allclose(loss, ref, rtol=1e-4, atol=1e-4), (loss, ref)

    print("KERNEL_OK")
</pallas_src>

<mosaic_0001>
module attributes {stable_mosaic.version = 11 : i64} {
  func.func @_yolo_loss_kernel(%arg0: i32, %arg1: memref<90x1x128xf32, #tpu.memory_space<vmem>>, %arg2: memref<85x1x128xf32, #tpu.memory_space<vmem>>, %arg3: memref<1x128xf32, #tpu.memory_space<vmem>>) attributes {dimension_semantics = [#tpu.dimension_semantics<parallel>], iteration_bounds = array<i64: 1>, scalar_prefetch = 0 : i64, scratch_operands = 0 : i64, tpu.core_type = #tpu.core_type<tc>, window_params = [{transform_indices = @transform_0, window_bounds = array<i64: 90, 1, 128>}, {transform_indices = @transform_1, window_bounds = array<i64: 85, 1, 128>}, {transform_indices = @transform_2, window_bounds = array<i64: 1, 128>}]} {
    %c80 = arith.constant 80 : index
    %c0 = arith.constant 0 : index
    %c0_0 = arith.constant 0 : index
    %0 = vector.load %arg2[%c80, %c0, %c0_0] : memref<85x1x128xf32, #tpu.memory_space<vmem>>, vector<1x1x128xf32>
    %1 = vector.shape_cast %0 : vector<1x1x128xf32> to vector<1x128xf32>
    %c81 = arith.constant 81 : index
    %c0_1 = arith.constant 0 : index
    %c0_2 = arith.constant 0 : index
    %2 = vector.load %arg2[%c81, %c0_1, %c0_2] : memref<85x1x128xf32, #tpu.memory_space<vmem>>, vector<1x1x128xf32>
    %3 = vector.shape_cast %2 : vector<1x1x128xf32> to vector<1x128xf32>
    %c82 = arith.constant 82 : index
    %c0_3 = arith.constant 0 : index
    %c0_4 = arith.constant 0 : index
    %4 = vector.load %arg2[%c82, %c0_3, %c0_4] : memref<85x1x128xf32, #tpu.memory_space<vmem>>, vector<1x1x128xf32>
    %5 = vector.shape_cast %4 : vector<1x1x128xf32> to vector<1x128xf32>
    %c83 = arith.constant 83 : index
    %c0_5 = arith.constant 0 : index
    %c0_6 = arith.constant 0 : index
    %6 = vector.load %arg2[%c83, %c0_5, %c0_6] : memref<85x1x128xf32, #tpu.memory_space<vmem>>, vector<1x1x128xf32>
    %7 = vector.shape_cast %6 : vector<1x1x128xf32> to vector<1x128xf32>
    %c84 = arith.constant 84 : index
    %c0_7 = arith.constant 0 : index
    %c0_8 = arith.constant 0 : index
    %8 = vector.load %arg2[%c84, %c0_7, %c0_8] : memref<85x1x128xf32, #tpu.memory_space<vmem>>, vector<1x1x128xf32>
    %9 = vector.shape_cast %8 : vector<1x1x128xf32> to vector<1x128xf32>
    %cst = arith.constant 7.000000e+00 : f32
    %cst_9 = arith.constant 5.000000e-01 : f32
    %10 = arith.mulf %cst, %cst_9 : f32
    %11 = vector.broadcast %10 : f32 to vector<1x128xf32>
    %12 = arith.mulf %5, %11 : vector<1x128xf32>
    %cst_10 = arith.constant 7.000000e+00 : f32
    %cst_11 = arith.constant 5.000000e-01 : f32
    %13 = arith.mulf %cst_10, %cst_11 : f32
    %14 = vector.broadcast %13 : f32 to vector<1x128xf32>
    %15 = arith.mulf %7, %14 : vector<1x128xf32>
    %16 = arith.subf %1, %12 : vector<1x128xf32>
    %17 = arith.addf %1, %12 : vector<1x128xf32>
    %18 = arith.subf %3, %15 : vector<1x128xf32>
    %19 = arith.addf %3, %15 : vector<1x128xf32>
    %20 = arith.subf %17, %16 : vector<1x128xf32>
    %21 = arith.subf %19, %18 : vector<1x128xf32>
    %22 = arith.mulf %20, %21 : vector<1x128xf32>
    %23 = math.absf %22 : vector<1x128xf32>
    %c80_12 = arith.constant 80 : index
    %c0_13 = arith.constant 0 : index
    %c0_14 = arith.constant 0 : index
    %24 = vector.load %arg1[%c80_12, %c0_13, %c0_14] : memref<90x1x128xf32, #tpu.memory_space<vmem>>, vector<1x1x128xf32>
    %25 = vector.shape_cast %24 : vector<1x1x128xf32> to vector<1x128xf32>
    %c81_15 = arith.constant 81 : index
    %c0_16 = arith.constant 0 : index
    %c0_17 = arith.constant 0 : index
    %26 = vector.load %arg1[%c81_15, %c0_16, %c0_17] : memref<90x1x128xf32, #tpu.memory_space<vmem>>, vector<1x1x128xf32>
    %27 = vector.shape_cast %26 : vector<1x1x128xf32> to vector<1x128xf32>
    %c82_18 = arith.constant 82 : index
    %c0_19 = arith.constant 0 : index
    %c0_20 = arith.constant 0 : index
    %28 = vector.load %arg1[%c82_18, %c0_19, %c0_20] : memref<90x1x128xf32, #tpu.memory_space<vmem>>, vector<1x1x128xf32>
    %29 = vector.shape_cast %28 : vector<1x1x128xf32> to vector<1x128xf32>
    %c83_21 = arith.constant 83 : index
    %c0_22 = arith.constant 0 : index
    %c0_23 = arith.constant 0 : index
    %30 = vector.load %arg1[%c83_21, %c0_22, %c0_23] : memref<90x1x128xf32, #tpu.memory_space<vmem>>, vector<1x1x128xf32>
    %31 = vector.shape_cast %30 : vector<1x1x128xf32> to vector<1x128xf32>
    %c84_24 = arith.constant 84 : index
    %c0_25 = arith.constant 0 : index
    %c0_26 = arith.constant 0 : index
    %32 = vector.load %arg1[%c84_24, %c0_25, %c0_26] : memref<90x1x128xf32, #tpu.memory_space<vmem>>, vector<1x1x128xf32>
    %33 = vector.shape_cast %32 : vector<1x1x128xf32> to vector<1x128xf32>
    %cst_27 = arith.constant 7.000000e+00 : f32
    %cst_28 = arith.constant 5.000000e-01 : f32
    %34 = arith.mulf %cst_27, %cst_28 : f32
    %35 = vector.broadcast %34 : f32 to vector<1x128xf32>
    %36 = arith.mulf %29, %35 : vector<1x128xf32>
    %cst_29 = arith.constant 7.000000e+00 : f32
    %cst_30 = arith.constant 5.000000e-01 : f32
    %37 = arith.mulf %cst_29, %cst_30 : f32
    %38 = vector.broadcast %37 : f32 to vector<1x128xf32>
    %39 = arith.mulf %31, %38 : vector<1x128xf32>
    %40 = arith.subf %25, %36 : vector<1x128xf32>
    %41 = arith.addf %25, %36 : vector<1x128xf32>
    %42 = arith.subf %27, %39 : vector<1x128xf32>
    %43 = arith.addf %27, %39 : vector<1x128xf32>
    %44 = arith.maximumf %40, %16 : vector<1x128xf32>
    %45 = arith.minimumf %41, %17 : vector<1x128xf32>
    %46 = arith.maximumf %42, %18 : vector<1x128xf32>
    %47 = arith.minimumf %43, %19 : vector<1x128xf32>
    %48 = arith.subf %45, %44 : vector<1x128xf32>
    %cst_31 = arith.constant 0.000000e+00 : f32
    %49 = vector.broadcast %cst_31 : f32 to vector<1x128xf32>
    %50 = arith.maximumf %48, %49 : vector<1x128xf32>
    %51 = arith.subf %47, %46 : vector<1x128xf32>
    %cst_32 = arith.constant 0.000000e+00 : f32
    %52 = vector.broadcast %cst_32 : f32 to vector<1x128xf32>
    %53 = arith.maximumf %51, %52 : vector<1x128xf32>
    %54 = arith.mulf %50, %53 : vector<1x128xf32>
    %55 = arith.subf %41, %40 : vector<1x128xf32>
    %56 = arith.subf %43, %42 : vector<1x128xf32>
    %57 = arith.mulf %55, %56 : vector<1x128xf32>
    %58 = math.absf %57 : vector<1x128xf32>
    %59 = arith.addf %58, %23 : vector<1x128xf32>
    %60 = arith.subf %59, %54 : vector<1x128xf32>
    %cst_33 = arith.constant 9.99999997E-7 : f32
    %61 = vector.broadcast %cst_33 : f32 to vector<1x128xf32>
    %62 = arith.addf %60, %61 : vector<1x128xf32>
    %63 = arith.mulf %33, %33 : vector<1x128xf32>
    %c85 = arith.constant 85 : index
    %c0_34 = arith.constant 0 : index
    %c0_35 = arith.constant 0 : index
    %64 = vector.load %arg1[%c85, %c0_34, %c0_35] : memref<90x1x128xf32, #tpu.memory_space<vmem>>, vector<1x1x128xf32>
    %65 = vector.shape_cast %64 : vector<1x1x128xf32> to vector<1x128xf32>
    %c86 = arith.constant 86 : index
    %c0_36 = arith.constant 0 : index
    %c0_37 = arith.constant 0 : index
    %66 = vector.load %arg1[%c86, %c0_36, %c0_37] : memref<90x1x128xf32, #tpu.memory_space<vmem>>, vector<1x1x128xf32>
    %67 = vector.shape_cast %66 : vector<1x1x128xf32> to vector<1x128xf32>
    %c87 = arith.constant 87 : index
    %c0_38 = arith.constant 0 : index
    %c0_39 = arith.constant 0 : index
    %68 = vector.load %arg1[%c87, %c0_38, %c0_39] : memref<90x1x128xf32, #tpu.memory_space<vmem>>, vector<1x1x128xf32>
    %69 = vector.shape_cast %68 : vector<1x1x128xf32> to vector<1x128xf32>
    %c88 = arith.constant 88 : index
    %c0_40 = arith.constant 0 : index
    %c0_41 = arith.constant 0 : index
    %70 = vector.load %arg1[%c88, %c0_40, %c0_41] : memref<90x1x128xf32, #tpu.memory_space<vmem>>, vector<1x1x128xf32>
    %71 = vector.shape_cast %70 : vector<1x1x128xf32> to vector<1x128xf32>
    %c89 = arith.constant 89 : index
    %c0_42 = arith.constant 0 : index
    %c0_43 = arith.constant 0 : index
    %72 = vector.load %arg1[%c89, %c0_42, %c0_43] : memref<90x1x128xf32, #tpu.memory_space<vmem>>, vector<1x1x128xf32>
    %73 = vector.shape_cast %72 : vector<1x1x128xf32> to vector<1x128xf32>
    %cst_44 = arith.constant 7.000000e+00 : f32
    %cst_45 = arith.constant 5.000000e-01 : f32
    %74 = arith.mulf %cst_44, %cst_45 : f32
    %75 = vector.broadcast %74 : f32 to vector<1x128xf32>
    %76 = arith.mulf %69, %75 : vector<1x128xf32>
    %cst_46 = arith.constant 7.000000e+00 : f32
    %cst_47 = arith.constant 5.000000e-01 : f32
    %77 = arith.mulf %cst_46, %cst_47 : f32
    %78 = vector.broadcast %77 : f32 to vector<1x128xf32>
    %79 = arith.mulf %71, %78 : vector<1x128xf32>
    %80 = arith.subf %65, %76 : vector<1x128xf32>
    %81 = arith.addf %65, %76 : vector<1x128xf32>
    %82 = arith.subf %67, %79 : vector<1x128xf32>
    %83 = arith.addf %67, %79 : vector<1x128xf32>
    %84 = arith.maximumf %80, %16 : vector<1x128xf32>
    %85 = arith.minimumf %81, %17 : vector<1x128xf32>
    %86 = arith.maximumf %82, %18 : vector<1x128xf32>
    %87 = arith.minimumf %83, %19 : vector<1x128xf32>
    %88 = arith.subf %85, %84 : vector<1x128xf32>
    %cst_48 = arith.constant 0.000000e+00 : f32
    %89 = vector.broadcast %cst_48 : f32 to vector<1x128xf32>
    %90 = arith.maximumf %88, %89 : vector<1x128xf32>
    %91 = arith.subf %87, %86 : vector<1x128xf32>
    %cst_49 = arith.constant 0.000000e+00 : f32
    %92 = vector.broadcast %cst_49 : f32 to vector<1x128xf32>
    %93 = arith.maximumf %91, %92 : vector<1x128xf32>
    %94 = arith.mulf %90, %93 : vector<1x128xf32>
    %95 = arith.subf %81, %80 : vector<1x128xf32>
    %96 = arith.subf %83, %82 : vector<1x128xf32>
    %97 = arith.mulf %95, %96 : vector<1x128xf32>
    %98 = math.absf %97 : vector<1x128xf32>
    %99 = arith.addf %98, %23 : vector<1x128xf32>
    %100 = arith.subf %99, %94 : vector<1x128xf32>
    %cst_50 = arith.constant 9.99999997E-7 : f32
    %101 = vector.broadcast %cst_50 : f32 to vector<1x128xf32>
    %102 = arith.addf %100, %101 : vector<1x128xf32>
    %103 = arith.mulf %73, %73 : vector<1x128xf32>
    %104 = arith.mulf %94, %62 : vector<1x128xf32>
    %105 = arith.mulf %54, %102 : vector<1x128xf32>
    %106 = arith.cmpf ogt, %104, %105 : vector<1x128xf32>
    %107 = arith.select %106, %65, %25 : vector<1x128xi1>, vector<1x128xf32>
    %108 = arith.select %106, %67, %27 : vector<1x128xi1>, vector<1x128xf32>
    %109 = arith.select %106, %69, %29 : vector<1x128xi1>, vector<1x128xf32>
    %110 = arith.select %106, %71, %31 : vector<1x128xi1>, vector<1x128xf32>
    %111 = arith.select %106, %73, %33 : vector<1x128xi1>, vector<1x128xf32>
    %112 = arith.addf %63, %103 : vector<1x128xf32>
    %cst_51 = arith.constant 0.000000e+00 : f32
    %113 = vector.broadcast %cst_51 : f32 to vector<1x128xf32>
    %114 = arith.maximumf %109, %113 : vector<1x128xf32>
    %cst_52 = arith.constant 0.000000e+00 : f32
    %115 = vector.broadcast %cst_52 : f32 to vector<1x128xf32>
    %116 = arith.maximumf %110, %115 : vector<1x128xf32>
    %117 = arith.addf %5, %114 : vector<1x128xf32>
    %118 = arith.mulf %5, %114 : vector<1x128xf32>
    %119 = math.sqrt %118 : vector<1x128xf32>
    %cst_53 = arith.constant 2.000000e+00 : f32
    %120 = vector.broadcast %cst_53 : f32 to vector<1x128xf32>
    %121 = arith.mulf %120, %119 : vector<1x128xf32>
    %122 = arith.subf %117, %121 : vector<1x128xf32>
    %123 = arith.addf %122, %7 : vector<1x128xf32>
    %124 = arith.addf %123, %116 : vector<1x128xf32>
    %125 = arith.mulf %7, %116 : vector<1x128xf32>
    %126 = math.sqrt %125 : vector<1x128xf32>
    %cst_54 = arith.constant 2.000000e+00 : f32
    %127 = vector.broadcast %cst_54 : f32 to vector<1x128xf32>
    %128 = arith.mulf %127, %126 : vector<1x128xf32>
    %129 = arith.subf %124, %128 : vector<1x128xf32>
    %130 = arith.subf %1, %107 : vector<1x128xf32>
    %131 = arith.mulf %130, %130 : vector<1x128xf32>
    %132 = arith.subf %3, %108 : vector<1x128xf32>
    %133 = arith.mulf %132, %132 : vector<1x128xf32>
    %134 = arith.addf %131, %133 : vector<1x128xf32>
    %135 = arith.addf %134, %129 : vector<1x128xf32>
    %c0_55 = arith.constant 0 : index
    %c0_56 = arith.constant 0 : index
    %c0_57 = arith.constant 0 : index
    %136 = vector.load %arg2[%c0_55, %c0_56, %c0_57] : memref<85x1x128xf32, #tpu.memory_space<vmem>>, vector<80x1x128xf32>
    %c0_58 = arith.constant 0 : index
    %c0_59 = arith.constant 0 : index
    %c0_60 = arith.constant 0 : index
    %137 = vector.load %arg1[%c0_58, %c0_59, %c0_60] : memref<90x1x128xf32, #tpu.memory_space<vmem>>, vector<80x1x128xf32>
    %138 = arith.subf %136, %137 : vector<80x1x128xf32>
    %139 = arith.mulf %138, %138 : vector<80x1x128xf32>
    %cst_61 = arith.constant dense<0.000000e+00> : vector<1x128xf32>
    %140 = vector.multi_reduction <add>, %139, %cst_61 [0] : vector<80x1x128xf32> to vector<1x128xf32>
    %cst_62 = arith.constant 5.000000e+00 : f32
    %141 = vector.broadcast %cst_62 : f32 to vector<1x128xf32>
    %142 = arith.mulf %141, %135 : vector<1x128xf32>
    %cst_63 = arith.constant 1.000000e+00 : f32
    %143 = vector.broadcast %cst_63 : f32 to vector<1x128xf32>
    %144 = arith.subf %143, %111 : vector<1x128xf32>
    %145 = arith.mulf %144, %144 : vector<1x128xf32>
    %146 = arith.addf %142, %145 : vector<1x128xf32>
    %147 = arith.addf %146, %140 : vector<1x128xf32>
    %148 = arith.mulf %9, %147 : vector<1x128xf32>
    %cst_64 = arith.constant 1.000000e+00 : f32
    %149 = vector.broadcast %cst_64 : f32 to vector<1x128xf32>
    %150 = arith.subf %149, %9 : vector<1x128xf32>
    %cst_65 = arith.constant 5.000000e-01 : f32
    %151 = vector.broadcast %cst_65 : f32 to vector<1x128xf32>
    %152 = arith.mulf %151, %150 : vector<1x128xf32>
    %153 = arith.mulf %152, %112 : vector<1x128xf32>
    %154 = arith.addf %148, %153 : vector<1x128xf32>
    %c0_66 = arith.constant 0 : index
    %c0_67 = arith.constant 0 : index
    %155 = vector.load %arg3[%c0_66, %c0_67] : memref<1x128xf32, #tpu.memory_space<vmem>>, vector<1x128xf32>
    tpu.vector_store %arg3[%c0_66, %c0_67], %154 {strides = array<i32>} : memref<1x128xf32, #tpu.memory_space<vmem>>, vector<1x128xf32>,
    return
  }
  func.func @transform_0(%arg0: i32) -> (i32, i32, i32) {
    %c0_i32 = arith.constant 0 : i32
    %c0_i32_0 = arith.constant 0 : i32
    %c0_i32_1 = arith.constant 0 : i32
    return %c0_i32, %arg0, %c0_i32_0 : i32, i32, i32
  }
  func.func @transform_1(%arg0: i32) -> (i32, i32, i32) {
    %c0_i32 = arith.constant 0 : i32
    %c0_i32_0 = arith.constant 0 : i32
    %c0_i32_1 = arith.constant 0 : i32
    return %c0_i32, %arg0, %c0_i32_0 : i32, i32, i32
  }
  func.func @transform_2(%arg0: i32) -> (i32, i32) {
    %c0_i32 = arith.constant 0 : i32
    %c0_i32_0 = arith.constant 0 : i32
    return %arg0, %c0_i32 : i32, i32
  }
}

</mosaic_0001>

<bundles_post_ra>
// kernel: tpu_custom_call.1
= control target key start
LH: loop header
LB: loop body
LE: loop exit
PB: predicated region body
PF: predicated region fallthrough
CT: control target
= control target key end

     0   :  { %7 = vsyncpa [#allocation3], 0  ;;  %s1015_s0 = inlined_call_operand.hbm [shape: f32[90,1,128], index: 0, kind: input, shape index: {}]   ;;  %s1016_s1 = inlined_call_operand.hbm [shape: f32[85,1,128], index: 1, kind: input, shape index: {}]   ;;  %s1017_s2 = inlined_call_operand.hbm [shape: f32[1,128], index: 2, kind: output, shape index: {}]  }
   0x1   :  { %8 = vsyncpa [#allocation6], 0 }
   0x2   :  { %9 = vsyncpa [#allocation4], 0  ;;  %s754_s9 = smov [#allocation2]   ;;  %s682_s13 = scalar_lea.hbm %s1015_s0, 1440 }
   0x3   :  { %s15_s10 = sshll.u32 %s754_s9, 4  ;;  %p683_p0 = scmp.ne.s32.totalorder %s1015_s0, %s682_s13  ;;  %s16_s10 = int_to_ptr.vmem [resolvable:$true] %s15_s10 }
   0x4   :  { %p686_p1 = scmp.lt.u32.totalorder %s682_s13, %s1015_s0 }
   0x6   :  { %p688_p2 = pnand %p686_p1, %p683_p0 }
   0x8   :  { %691 = shalt.err (!%p688_p2)
}
   0x9   :  { %s692_s18 = scalar_lea.vmem %s16_s10, 1440  ;;  %p697_p4 = scmp.lt.s32.totalorder %s16_s10, %s16_s10 }
   0xa   :  { %p693_p3 = scmp.ne.s32.totalorder %s16_s10, %s692_s18  ;;  %p698_p5 = scmp.lt.s32.totalorder %s692_s18, %s692_s18 }
   0xc   :  { %p699_p6 = por %p698_p5, %p697_p4 }
   0xe   :  { %p700_p7 = pnand %p699_p6, %p693_p3 }
  0x10   :  { %703 = shalt.err (!%p700_p7)
}
  0x11   :  { %s755_s19 = smov 16   ;;  %s756_s20 = smov 1  }
  0x12   :  { %21 = dma.hbm_to_vmem [thread:$0]  %s1015_s0, 1440, %s16_s10, [#allocation3], %s755_s19, %s755_s19, %s756_s20  }
  0x13   :  { %s757_s23 = smov [#allocation5]   ;;  %s704_s27 = scalar_lea.hbm %s1016_s1, 1360 }
  0x14   :  { %s27_s24 = sshll.u32 %s757_s23, 4  ;;  %p705_p8 = scmp.ne.s32.totalorder %s1016_s1, %s704_s27  ;;  %s28_s24 = int_to_ptr.vmem [resolvable:$true] %s27_s24 }
  0x15   :  { %p708_p9 = scmp.lt.u32.totalorder %s704_s27, %s1016_s1 }
  0x17   :  { %p710_p10 = pnand %p708_p9, %p705_p8 }
  0x19   :  { %713 = shalt.err (!%p710_p10)
}
  0x1a   :  { %s714_s4 = scalar_lea.vmem %s28_s24, 1360  ;;  %s718_s0 = scalar_lea.vmem %s28_s24, 1376 }
  0x1b   :  { %p715_p11 = scmp.ne.s32.totalorder %s28_s24, %s714_s4  ;;  %p719_p12 = scmp.lt.s32.totalorder %s28_s24, %s28_s24 }
  0x1c   :  { %p720_p13 = scmp.lt.s32.totalorder %s718_s0, %s714_s4 }
  0x1e   :  { %p721_p0 = por %p720_p13, %p719_p12 }
  0x20   :  { %p722_p1 = pnand %p721_p0, %p715_p11 }
  0x22   :  { %725 = shalt.err (!%p722_p1)
}
  0x23   :  { %33 = dma.hbm_to_vmem [thread:$0]  %s1016_s1, 1360, %s28_s24, [#allocation6], %s755_s19, %s755_s19, %s756_s20  }
  0x24   :  { %748 = dma.done.wait [#allocation3], 1440  }
  0x25   :  { %749 = vsyncadd [#allocation3], 4294965856 }
  0x26   :  { %750 = dma.done.wait [#allocation6], 1360  }
  0x27   :  { %751 = vsyncadd [#allocation6], 4294965936  ;;  %v166_v0 = vld [vmem:[#allocation5] sm:$0x1]  ;;  %v167_v1 = vld [vmem:[#allocation5 + $0x1] sm:$0x1] }
  0x28   :  { %v168_v2 = vld [vmem:[#allocation5 + $0x2] sm:$0x1]  ;;  %v246_v3 = vld [vmem:[#allocation2] sm:$0x1]  ;;  %v247_v4 = vld [vmem:[#allocation2 + $0x1] sm:$0x1] }
  0x29   :  { %v248_v5 = vld [vmem:[#allocation2 + $0x2] sm:$0x1]  ;;  %v169_v6 = vld [vmem:[#allocation5 + $0x3] sm:$0x1]  ;;  %v249_v7 = vld [vmem:[#allocation2 + $0x3] sm:$0x1]  ;;  %v326_v8 = vsub.f32 %v166_v0, %v246_v3  ;;  %v327_v9 = vsub.f32 %v167_v1, %v247_v4 }
  0x2a   :  { %v328_v10 = vsub.f32 %v168_v2, %v248_v5  ;;  %v170_v11 = vld [vmem:[#allocation5 + $0x4] sm:$0x1]  ;;  %v250_v12 = vld [vmem:[#allocation2 + $0x4] sm:$0x1]  ;;  %v329_v13 = vsub.f32 %v169_v6, %v249_v7  ;;  %v171_v14 = vld [vmem:[#allocation5 + $0x5] sm:$0x1] }
  0x2b   :  { %v251_v15 = vld [vmem:[#allocation2 + $0x5] sm:$0x1]  ;;  %v172_v16 = vld [vmem:[#allocation5 + $0x6] sm:$0x1]  ;;  %v252_v17 = vld [vmem:[#allocation2 + $0x6] sm:$0x1]  ;;  %v330_v18 = vsub.f32 %v170_v11, %v250_v12  ;;  %v406_v19 = vmul.f32 %v326_v8, %v326_v8  ;;  %v407_v20 = vmul.f32 %v327_v9, %v327_v9 }
  0x2c   :  { %v408_v21 = vmul.f32 %v328_v10, %v328_v10  ;;  %vm486_vm0 = vcmask 1040384   ;;  %v331_v22 = vsub.f32 %v171_v14, %v251_v15  ;;  %v409_v23 = vmul.f32 %v329_v13, %v329_v13  ;;  %v173_v24 = vld [vmem:[#allocation5 + $0x7] sm:$0x1]  ;;  %v253_v25 = vld [vmem:[#allocation2 + $0x7] sm:$0x1]  ;;  %s758_s1 = smov [#allocation7]  }
  0x2d   :  { %v332_v26 = vsub.f32 %v172_v16, %v252_v17  ;;  %v410_v27 = vmul.f32 %v330_v18, %v330_v18  ;;  %v487_v28 = vsel %vm486_vm0, %v406_v19, 0.0  ;;  %v488_v29 = vsel %vm486_vm0, %v407_v20, 0.0  ;;  %v174_v31 = vld [vmem:[#allocation5 + $0x8] sm:$0x1]  ;;  %v254_v32 = vld [vmem:[#allocation2 + $0x8] sm:$0x1] }
  0x2e   :  { %v490_v30 = vsel %vm486_vm0, %v408_v21, 0.0  ;;  %v489_v33 = vadd.f32 %v488_v29, %v487_v28  ;;  %v333_v34 = vsub.f32 %v173_v24, %v253_v25  ;;  %v411_v35 = vmul.f32 %v331_v22, %v331_v22  ;;  %v175_v37 = vld [vmem:[#allocation5 + $0x9] sm:$0x1]  ;;  %v255_v38 = vld [vmem:[#allocation2 + $0x9] sm:$0x1]  ;;  %s663_s7 = sshll.u32 %s758_s1, 4  ;;  %s664_s7 = int_to_ptr.vmem [resolvable:$true] %s663_s7 }
  0x2f   :  { %v492_v36 = vsel %vm486_vm0, %v409_v23, 0.0  ;;  %v334_v40 = vsub.f32 %v174_v31, %v254_v32  ;;  %v412_v41 = vmul.f32 %v332_v26, %v332_v26  ;;  %v494_v42 = vsel %vm486_vm0, %v410_v27, 0.0  ;;  %v176_v43 = vld [vmem:[#allocation5 + $0xa] sm:$0x1]  ;;  %v256_v44 = vld [vmem:[#allocation2 + $0xa] sm:$0x1]  ;;  %p731_p3 = scmp.lt.s32.totalorder %s664_s7, %s664_s7 }
  0x30   :  { %v491_v39 = vadd.f32 %v490_v30, %v489_v33  ;;  %v335_v46 = vsub.f32 %v175_v37, %v255_v38  ;;  %v413_v47 = vmul.f32 %v333_v34, %v333_v34  ;;  %v496_v48 = vsel %vm486_vm0, %v411_v35, 0.0  ;;  %v177_v49 = vld [vmem:[#allocation5 + $0xb] sm:$0x1]  ;;  %v257_v50 = vld [vmem:[#allocation2 + $0xb] sm:$0x1]  ;;  %s726_s8 = scalar_lea.vmem %s664_s7, 16 }
  0x31   :  { %v336_v52 = vsub.f32 %v176_v43, %v256_v44  ;;  %v414_v53 = vmul.f32 %v334_v40, %v334_v40  ;;  %v498_v54 = vsel %vm486_vm0, %v412_v41, 0.0  ;;  %v178_v55 = vld [vmem:[#allocation5 + $0xc] sm:$0x1]  ;;  %v258_v56 = vld [vmem:[#allocation2 + $0xc] sm:$0x1]  ;;  %v337_v58 = vsub.f32 %v177_v49, %v257_v50  ;;  %p727_p2 = scmp.ne.s32.totalorder %s664_s7, %s726_s8  ;;  %s730_s9 = scalar_lea.vmem %s664_s7, 32 }
  0x32   :  { %v493_v45 = vadd.f32 %v492_v36, %v491_v39  ;;  %v415_v59 = vmul.f32 %v335_v46, %v335_v46  ;;  %v500_v60 = vsel %vm486_vm0, %v413_v47, 0.0  ;;  %v179_v61 = vld [vmem:[#allocation5 + $0xd] sm:$0x1]  ;;  %v259_v62 = vld [vmem:[#allocation2 + $0xd] sm:$0x1]  ;;  %v338_v0 = vsub.f32 %v178_v55, %v258_v56  ;;  %p732_p4 = scmp.lt.s32.totalorder %s730_s9, %s726_s8 }
  0x33   :  { %v416_v1 = vmul.f32 %v336_v52, %v336_v52  ;;  %v502_v2 = vsel %vm486_vm0, %v414_v53, 0.0  ;;  %v180_v3 = vld [vmem:[#allocation5 + $0xe] sm:$0x1]  ;;  %v260_v4 = vld [vmem:[#allocation2 + $0xe] sm:$0x1]  ;;  %v339_v6 = vsub.f32 %v179_v61, %v259_v62  ;;  %v417_v7 = vmul.f32 %v337_v58, %v337_v58 }
  0x34   :  { %v495_v51 = vadd.f32 %v494_v42, %v493_v45  ;;  %v504_v8 = vsel %vm486_vm0, %v415_v59, 0.0  ;;  %v181_v9 = vld [vmem:[#allocation5 + $0xf] sm:$0x1]  ;;  %v261_v10 = vld [vmem:[#allocation2 + $0xf] sm:$0x1]  ;;  %v340_v12 = vsub.f32 %v180_v3, %v260_v4  ;;  %v418_v13 = vmul.f32 %v338_v0, %v338_v0  ;;  %p733_p5 = por %p732_p4, %p731_p3 }
  0x35   :  { %v506_v14 = vsel %vm486_vm0, %v416_v1, 0.0  ;;  %v182_v15 = vld [vmem:[#allocation5 + $0x10] sm:$0x1]  ;;  %v262_v16 = vld [vmem:[#allocation2 + $0x10] sm:$0x1]  ;;  %v341_v18 = vsub.f32 %v181_v9, %v261_v10  ;;  %v419_v19 = vmul.f32 %v339_v6, %v339_v6  ;;  %v508_v20 = vsel %vm486_vm0, %v417_v7, 0.0 }
  0x36   :  { %v497_v57 = vadd.f32 %v496_v48, %v495_v51  ;;  %v183_v21 = vld [vmem:[#allocation5 + $0x11] sm:$0x1]  ;;  %v263_v22 = vld [vmem:[#allocation2 + $0x11] sm:$0x1]  ;;  %v342_v24 = vsub.f32 %v182_v15, %v262_v16  ;;  %v420_v25 = vmul.f32 %v340_v12, %v340_v12  ;;  %v510_v26 = vsel %vm486_vm0, %v418_v13, 0.0  ;;  %p734_p6 = pnand %p733_p5, %p727_p2 }
  0x37   :  { %v184_v27 = vld [vmem:[#allocation5 + $0x12] sm:$0x1]  ;;  %v264_v28 = vld [vmem:[#allocation2 + $0x12] sm:$0x1]  ;;  %v343_v30 = vsub.f32 %v183_v21, %v263_v22  ;;  %v421_v31 = vmul.f32 %v341_v18, %v341_v18  ;;  %v512_v32 = vsel %vm486_vm0, %v419_v19, 0.0 }
  0x38   :  { %v499_v63 = vadd.f32 %v498_v54, %v497_v57  ;;  %v185_v33 = vld [vmem:[#allocation5 + $0x13] sm:$0x1]  ;;  %v265_v34 = vld [vmem:[#allocation2 + $0x13] sm:$0x1]  ;;  %v344_v36 = vsub.f32 %v184_v27, %v264_v28  ;;  %v422_v37 = vmul.f32 %v342_v24, %v342_v24  ;;  %v514_v38 = vsel %vm486_vm0, %v420_v25, 0.0 }
  0x39   :  { %v186_v39 = vld [vmem:[#allocation5 + $0x14] sm:$0x1]  ;;  %v266_v40 = vld [vmem:[#allocation2 + $0x14] sm:$0x1]  ;;  %v345_v42 = vsub.f32 %v185_v33, %v265_v34  ;;  %v423_v43 = vmul.f32 %v343_v30, %v343_v30  ;;  %v516_v44 = vsel %vm486_vm0, %v421_v31, 0.0 }
  0x3a   :  { %v501_v5 = vadd.f32 %v500_v60, %v499_v63  ;;  %v187_v45 = vld [vmem:[#allocation5 + $0x15] sm:$0x1]  ;;  %v267_v46 = vld [vmem:[#allocation2 + $0x15] sm:$0x1]  ;;  %v346_v48 = vsub.f32 %v186_v39, %v266_v40  ;;  %v424_v49 = vmul.f32 %v344_v36, %v344_v36  ;;  %v518_v50 = vsel %vm486_vm0, %v422_v37, 0.0 }
  0x3b   :  { %v188_v51 = vld [vmem:[#allocation5 + $0x16] sm:$0x1]  ;;  %v268_v52 = vld [vmem:[#allocation2 + $0x16] sm:$0x1]  ;;  %v347_v54 = vsub.f32 %v187_v45, %v267_v46  ;;  %v425_v55 = vmul.f32 %v345_v42, %v345_v42  ;;  %v520_v56 = vsel %vm486_vm0, %v423_v43, 0.0 }
  0x3c   :  { %v503_v11 = vadd.f32 %v502_v2, %v501_v5  ;;  %v189_v57 = vld [vmem:[#allocation5 + $0x17] sm:$0x1]  ;;  %v269_v58 = vld [vmem:[#allocation2 + $0x17] sm:$0x1]  ;;  %v348_v60 = vsub.f32 %v188_v51, %v268_v52  ;;  %v426_v61 = vmul.f32 %v346_v48, %v346_v48  ;;  %v522_v62 = vsel %vm486_vm0, %v424_v49, 0.0 }
  0x3d   :  { %v190_v63 = vld [vmem:[#allocation5 + $0x18] sm:$0x1]  ;;  %v270_v0 = vld [vmem:[#allocation2 + $0x18] sm:$0x1]  ;;  %v349_v2 = vsub.f32 %v189_v57, %v269_v58  ;;  %v427_v3 = vmul.f32 %v347_v54, %v347_v54  ;;  %v524_v4 = vsel %vm486_vm0, %v425_v55, 0.0 }
  0x3e   :  { %v505_v17 = vadd.f32 %v504_v8, %v503_v11  ;;  %v191_v5 = vld [vmem:[#allocation5 + $0x19] sm:$0x1]  ;;  %v271_v6 = vld [vmem:[#allocation2 + $0x19] sm:$0x1]  ;;  %v350_v8 = vsub.f32 %v190_v63, %v270_v0  ;;  %v428_v9 = vmul.f32 %v348_v60, %v348_v60  ;;  %v526_v10 = vsel %vm486_vm0, %v426_v61, 0.0 }
  0x3f   :  { %v192_v11 = vld [vmem:[#allocation5 + $0x1a] sm:$0x1]  ;;  %v272_v12 = vld [vmem:[#allocation2 + $0x1a] sm:$0x1]  ;;  %v821_v15 = vld [vmem:[#allocation5 + $0x53] sm:$0x1]  ;;  %v351_v16 = vsub.f32 %v191_v5, %v271_v6 }
  0x40   :  { %v507_v23 = vadd.f32 %v506_v14, %v505_v17  ;;  %v819_v14 = vld [vmem:[#allocation5 + $0x52] sm:$0x1]  ;;  %v429_v17 = vmul.f32 %v349_v2, %v349_v2  ;;  %v528_v18 = vsel %vm486_vm0, %v427_v3, 0.0  ;;  %v193_v19 = vld [vmem:[#allocation5 + $0x1b] sm:$0x1]  ;;  %v352_v22 = vsub.f32 %v192_v11, %v272_v12 }
  0x41   :  { %v530_v24 = vsel %vm486_vm0, %v428_v9, 0.0  ;;  %v50_v25 = vmul.f32 3.5, %v819_v14  ;;  %v194_v27 = vld [vmem:[#allocation5 + $0x1c] sm:$0x1]  ;;  %v274_v28 = vld [vmem:[#allocation2 + $0x1c] sm:$0x1]  ;;  %v431_v33 = vmul.f32 %v351_v16, %v351_v16 }
  0x42   :  { %v509_v29 = vadd.f32 %v508_v20, %v507_v23  ;;  %v273_v20 = vld [vmem:[#allocation2 + $0x1b] sm:$0x1]  ;;  %v430_v23 = vmul.f32 %v350_v8, %v350_v8  ;;  %v827_v30 = vld [vmem:[#allocation5 + $0x50] sm:$0x1]  ;;  %v829_v31 = vld [vmem:[#allocation5 + $0x51] sm:$0x1]  ;;  %v354_v39 = vsub.f32 %v194_v27, %v274_v28  ;;  %v432_v40 = vmul.f32 %v352_v22, %v352_v22 }
  0x43   :  { %v532_v34 = vsel %vm486_vm0, %v429_v17, 0.0  ;;  %v275_v36 = vld [vmem:[#allocation2 + $0x1d] sm:$0x1]  ;;  %v836_v42 = vsub.f32 %v827_v30, %v50_v25  ;;  %v839_v43 = vadd.f32 %v50_v25, %v827_v30  ;;  %v196_v45 = vld [vmem:[#allocation5 + $0x1e] sm:$0x1]  ;;  %v536_v52 = vsel %vm486_vm0, %v431_v33, 0.0 }
  0x44   :  { %v511_v35 = vadd.f32 %v510_v26, %v509_v29  ;;  %v51_v26 = vmul.f32 3.5, %v821_v15  ;;  %v276_v46 = vld [vmem:[#allocation2 + $0x1e] sm:$0x1]  ;;  %v847_v49 = vld [vmem:[#allocation2 + $0x53] sm:$0x1]  ;;  %v434_v60 = vmul.f32 %v354_v39, %v354_v39  ;;  %v538_v61 = vsel %vm486_vm0, %v432_v40, 0.0 }
  0x45   :  { %v197_v54 = vld [vmem:[#allocation5 + $0x1f] sm:$0x1]  ;;  %v277_v55 = vld [vmem:[#allocation2 + $0x1f] sm:$0x1]  ;;  %v851_v57 = vld [vmem:[#allocation2 + $0x50] sm:$0x1] }
  0x46   :  { %v513_v41 = vadd.f32 %v512_v32, %v511_v35  ;;  %v353_v32 = vsub.f32 %v193_v19, %v273_v20  ;;  %v195_v35 = vld [vmem:[#allocation5 + $0x1d] sm:$0x1]  ;;  %v845_v48 = vadd.f32 %v51_v26, %v829_v31  ;;  %v71_v63 = vmul.f32 3.5, %v847_v49  ;;  %v198_v0 = vld [vmem:[#allocation5 + $0x20] sm:$0x1] }
  0x47   :  { %v853_v58 = vld [vmem:[#allocation2 + $0x57] sm:$0x1]  ;;  %v863_v5 = vld [vmem:[#allocation2 + $0x58] sm:$0x1]  ;;  %v357_v6 = vsub.f32 %v197_v54, %v277_v55  ;;  %v199_v12 = vld [vmem:[#allocation5 + $0x21] sm:$0x1] }
  0x48   :  { %v515_v47 = vadd.f32 %v514_v38, %v513_v41  ;;  %v832_v38 = vld [vmem:[#allocation2 + $0x52] sm:$0x1]  ;;  %v534_v41 = vsel %vm486_vm0, %v430_v23, 0.0  ;;  %v433_v51 = vmul.f32 %v353_v32, %v353_v32  ;;  %v103_v11 = vmul.f32 3.5, %v853_v58  ;;  %v873_v17 = vld [vmem:[#allocation2 + $0x55] sm:$0x1] }
  0x49   :  { %v542_v20 = vsel %vm486_vm0, %v434_v60, 0.0  ;;  %v104_v23 = vmul.f32 3.5, %v863_v5  ;;  %v280_v25 = vld [vmem:[#allocation2 + $0x22] sm:$0x1]  ;;  %v881_v28 = vld [vmem:[#allocation2 + $0x56] sm:$0x1]  ;;  %v437_v32 = vmul.f32 %v357_v6, %v357_v6 }
  0x4a   :  { %v517_v53 = vadd.f32 %v516_v44, %v515_v47  ;;  %v842_v44 = vsub.f32 %v829_v31, %v51_v26  ;;  %v540_v8 = vsel %vm486_vm0, %v433_v51, 0.0  ;;  %v281_v39 = vld [vmem:[#allocation2 + $0x23] sm:$0x1]  ;;  %v282_v54 = vld [vmem:[#allocation2 + $0x24] sm:$0x1] }
  0x4b   :  { %v107_v51 = vsub.f32 %v881_v28, %v104_v23 }
  0x4c   :  { %v519_v59 = vadd.f32 %v518_v50, %v517_v53  ;;  %v355_v50 = vsub.f32 %v195_v35, %v275_v36  ;;  %v70_v53 = vmul.f32 3.5, %v832_v38  ;;  %v57_v3 = vsub.f32 %v845_v48, %v842_v44 }
  0x4d   :  { %v105_v36 = vsub.f32 %v873_v17, %v103_v11 }
  0x4e   :  { %v521_v1 = vadd.f32 %v520_v56, %v519_v59  ;;  %v356_v59 = vsub.f32 %v196_v45, %v276_v46  ;;  %v867_v9 = vsub.f32 %v851_v57, %v70_v53 }
  0x50   :  { %v523_v7 = vadd.f32 %v522_v62, %v521_v1  ;;  %v56_v62 = vsub.f32 %v839_v43, %v836_v42  ;;  %v278_v1 = vld [vmem:[#allocation2 + $0x20] sm:$0x1]  ;;  %v436_v19 = vmul.f32 %v356_v59, %v356_v59 }
  0x52   :  { %v525_v13 = vadd.f32 %v524_v4, %v523_v7  ;;  %v861_v4 = vld [vmem:[#allocation2 + $0x51] sm:$0x1]  ;;  %v435_v7 = vmul.f32 %v355_v50, %v355_v50  ;;  %v879_v27 = vmul.f32 %v57_v3, %v56_v62 }
  0x53   :  { %v75_v22 = vadd.f32 %v71_v63, %v861_v4 }
  0x54   :  { %v527_v21 = vadd.f32 %v526_v10, %v525_v13  ;;  %v870_v10 = vadd.f32 %v70_v53, %v851_v57  ;;  %v279_v13 = vld [vmem:[#allocation2 + $0x21] sm:$0x1]  ;;  %v544_v33 = vsel %vm486_vm0, %v435_v7, 0.0  ;;  %v202_v53 = vld [vmem:[#allocation5 + $0x24] sm:$0x1] }
  0x55   :  { %v362_v7 = vsub.f32 %v202_v53, %v282_v54 }
  0x56   :  { %v529_v29 = vadd.f32 %v528_v18, %v527_v21  ;;  %v358_v18 = vsub.f32 %v198_v0, %v278_v1  ;;  %v74_v21 = vsub.f32 %v861_v4, %v71_v63  ;;  %v77_v35 = vmin.f32 %v870_v10, %v839_v43  ;;  %v203_v1 = vld [vmem:[#allocation5 + $0x25] sm:$0x1] }
  0x57   :  { %v85_v62 = vsub.f32 %v870_v10, %v867_v9  ;;  %v109_v0 = vmax.f32 %v105_v36, %v836_v42 }
  0x58   :  { %v531_v37 = vadd.f32 %v530_v24, %v529_v29  ;;  %v200_v24 = vld [vmem:[#allocation5 + $0x22] sm:$0x1]  ;;  %v359_v29 = vsub.f32 %v199_v12, %v279_v13  ;;  %v438_v46 = vmul.f32 %v358_v18, %v358_v18  ;;  %v78_v50 = vmax.f32 %v74_v21, %v842_v44  ;;  %v204_v18 = vld [vmem:[#allocation5 + $0x26] sm:$0x1] }
  0x59   :  { %v360_v45 = vsub.f32 %v200_v24, %v280_v25  ;;  %v86_v63 = vsub.f32 %v75_v22, %v74_v21  ;;  %v111_v12 = vmax.f32 %v107_v51, %v842_v44  ;;  %v285_v24 = vld [vmem:[#allocation2 + $0x27] sm:$0x1] }
  0x5a   :  { %v533_v47 = vadd.f32 %v532_v34, %v531_v37  ;;  %v76_v34 = vmax.f32 %v867_v9, %v836_v42  ;;  %v201_v37 = vld [vmem:[#allocation5 + $0x23] sm:$0x1]  ;;  %v439_v60 = vmul.f32 %v359_v29, %v359_v29 }
  0x5b   :  { %v361_v59 = vsub.f32 %v201_v37, %v281_v39  ;;  %v206_v37 = vld [vmem:[#allocation5 + $0x28] sm:$0x1]  ;;  %v286_v39 = vld [vmem:[#allocation2 + $0x28] sm:$0x1] }
  0x5c   :  { %v535_v56 = vadd.f32 %v534_v41, %v533_v47  ;;  %v106_v41 = vadd.f32 %v103_v11, %v873_v17  ;;  %v546_v47 = vsel %vm486_vm0, %v436_v19, 0.0  ;;  %v550_v11 = vsel %vm486_vm0, %v438_v46, 0.0  ;;  %v284_v19 = vld [vmem:[#allocation2 + $0x26] sm:$0x1] }
  0x5d   :  { %v441_v42 = vmul.f32 %v361_v59, %v361_v59  ;;  %v552_v21 = vsel %vm486_vm0, %v439_v60, 0.0  ;;  %v364_v29 = vsub.f32 %v204_v18, %v284_v19  ;;  %v366_v54 = vsub.f32 %v206_v37, %v286_v39  ;;  %v208_v60 = vld [vmem:[#allocation5 + $0x2a] sm:$0x1]  ;;  %v210_v19 = vld [vmem:[#allocation5 + $0x2c] sm:$0x1] }
  0x5e   :  { %v537_v2 = vadd.f32 %v536_v52, %v535_v56  ;;  %v108_v52 = vadd.f32 %v104_v23, %v881_v28  ;;  %v79_v56 = vmin.f32 %v75_v22, %v845_v48  ;;  %v110_v6 = vmin.f32 %v106_v41, %v839_v43  ;;  %v205_v43 = vld [vmem:[#allocation5 + $0x27] sm:$0x1] }
  0x5f   :  { %v80_v22 = vsub.f32 %v77_v35, %v76_v34  ;;  %v556_v34 = vsel %vm486_vm0, %v441_v42, 0.0 }
  0x60   :  { %v539_v16 = vadd.f32 %v538_v61, %v537_v2  ;;  %v548_v61 = vsel %vm486_vm0, %v437_v32, 0.0  ;;  %v283_v2 = vld [vmem:[#allocation2 + $0x25] sm:$0x1]  ;;  %v112_v13 = vmin.f32 %v108_v52, %v845_v48  ;;  %v119_v10 = vsub.f32 %v108_v52, %v107_v51  ;;  %v287_v51 = vld [vmem:[#allocation2 + $0x29] sm:$0x1] }
  0x61   :  { %v82_v23 = vsub.f32 %v79_v56, %v78_v50  ;;  %v442_v32 = vmul.f32 %v362_v7, %v362_v7  ;;  %v59_v48 = vand.u32 2147483647, %v879_v27  ;;  %v81_v35 = vmax.f32 %v80_v22, 0.0  ;;  %v207_v50 = vld [vmem:[#allocation5 + $0x29] sm:$0x1] }
  0x62   :  { %v541_v26 = vadd.f32 %v540_v8, %v539_v16  ;;  %v440_v8 = vmul.f32 %v360_v45, %v360_v45  ;;  %v118_v16 = vsub.f32 %v106_v41, %v105_v36  ;;  %v115_v36 = vsub.f32 %v112_v13, %v111_v12 }
  0x63   :  { %v365_v45 = vsub.f32 %v205_v43, %v285_v24  ;;  %v558_v27 = vsel %vm486_vm0, %v442_v32, 0.0  ;;  %v291_v43 = vld [vmem:[#allocation2 + $0x2d] sm:$0x1] }
  0x64   :  { %v543_v40 = vadd.f32 %v542_v20, %v541_v26  ;;  %v363_v20 = vsub.f32 %v203_v1, %v283_v2  ;;  %v87_v26 = vmul.f32 %v86_v63, %v85_v62  ;;  %v554_v44 = vsel %vm486_vm0, %v440_v8, 0.0 }
  0x65   :  { %v120_v41 = vmul.f32 %v119_v10, %v118_v16  ;;  %v116_v59 = vmax.f32 %v115_v36, 0.0  ;;  %v445_v1 = vmul.f32 %v365_v45, %v365_v45  ;;  %v293_v45 = vld [vmem:[#allocation2 + $0x2f] sm:$0x1] }
  0x66   :  { %v545_v55 = vadd.f32 %v544_v33, %v543_v40  ;;  %v113_v33 = vsub.f32 %v110_v6, %v109_v0  ;;  %v443_v46 = vmul.f32 %v363_v20, %v363_v20  ;;  %v88_v53 = vand.u32 2147483647, %v87_v26  ;;  %v289_v6 = vld [vmem:[#allocation2 + $0x2b] sm:$0x1] }
  0x67   :  { %v121_v63 = vand.u32 2147483647, %v120_v41  ;;  %v367_v0 = vsub.f32 %v207_v50, %v287_v51  ;;  %v564_v22 = vsel %vm486_vm0, %v445_v1, 0.0  ;;  %v213_v41 = vld [vmem:[#allocation5 + $0x2f] sm:$0x1] }
  0x68   :  { %v547_v3 = vadd.f32 %v546_v47, %v545_v55  ;;  %v83_v47 = vmax.f32 %v82_v23, 0.0  ;;  %v444_v55 = vmul.f32 %v364_v29, %v364_v29  ;;  %v114_v56 = vmax.f32 %v113_v33, 0.0  ;;  %v211_v23 = vld [vmem:[#allocation5 + $0x2d] sm:$0x1]  ;;  %v292_v33 = vld [vmem:[#allocation2 + $0x2e] sm:$0x1] }
  0x69   :  { %v560_v2 = vsel %vm486_vm0, %v443_v46, 0.0  ;;  %v89_v16 = vadd.f32 %v88_v53, %v59_v48  ;;  %v122_v20 = vadd.f32 %v121_v63, %v59_v48  ;;  %v371_v39 = vsub.f32 %v211_v23, %v291_v43  ;;  %v214_v51 = vld [vmem:[#allocation5 + $0x30] sm:$0x1] }
  0x6a   :  { %v549_v9 = vadd.f32 %v548_v61, %v547_v3  ;;  %v288_v61 = vld [vmem:[#allocation2 + $0x2a] sm:$0x1]  ;;  %v209_v3 = vld [vmem:[#allocation5 + $0x2b] sm:$0x1]  ;;  %v562_v12 = vsel %vm486_vm0, %v444_v55, 0.0  ;;  %v84_v13 = vmul.f32 %v83_v47, %v81_v35  ;;  %v117_v18 = vmul.f32 %v116_v59, %v114_v56 }
  0x6b   :  { %v368_v8 = vsub.f32 %v208_v60, %v288_v61  ;;  %v369_v42 = vsub.f32 %v209_v3, %v289_v6  ;;  %v373_v55 = vsub.f32 %v213_v41, %v293_v45  ;;  %v215_v59 = vld [vmem:[#allocation5 + $0x31] sm:$0x1]  ;;  %v295_v60 = vld [vmem:[#allocation2 + $0x31] sm:$0x1]  ;;  %v296_v3 = vld [vmem:[#allocation2 + $0x32] sm:$0x1] }
  0x6c   :  { %v551_v25 = vadd.f32 %v550_v11, %v549_v9  ;;  %v446_v11 = vmul.f32 %v366_v54, %v366_v54  ;;  %v290_v9 = vld [vmem:[#allocation2 + $0x2c] sm:$0x1]  ;;  %v90_v32 = vsub.f32 %v89_v16, %v84_v13  ;;  %v123_v37 = vsub.f32 %v122_v20, %v117_v18  ;;  %v217_v16 = vld [vmem:[#allocation5 + $0x33] sm:$0x1] }
  0x6d   :  { %v448_v26 = vmul.f32 %v368_v8, %v368_v8  ;;  %v375_v8 = vsub.f32 %v215_v59, %v295_v60  ;;  %v303_v59 = vld [vmem:[#allocation2 + $0x39] sm:$0x1] }
  0x6e   :  { %v553_v40 = vadd.f32 %v552_v21, %v551_v25  ;;  %v447_v21 = vmul.f32 %v367_v0, %v367_v0  ;;  %v370_v25 = vsub.f32 %v210_v19, %v290_v9  ;;  %v566_v29 = vsel %vm486_vm0, %v446_v11, 0.0  ;;  %v297_v19 = vld [vmem:[#allocation2 + $0x33] sm:$0x1] }
  0x6f   :  { %v570_v47 = vsel %vm486_vm0, %v448_v26, 0.0  ;;  %v91_v50 = vadd.f32 1e-06, %v90_v32  ;;  %v124_v54 = vadd.f32 1e-06, %v123_v37  ;;  %v453_v11 = vmul.f32 %v373_v55, %v373_v55 }
  0x70   :  { %v555_v52 = vadd.f32 %v554_v44, %v553_v40  ;;  %v212_v44 = vld [vmem:[#allocation5 + $0x2e] sm:$0x1]  ;;  %v449_v40 = vmul.f32 %v369_v42, %v369_v42  ;;  %v568_v48 = vsel %vm486_vm0, %v447_v21, 0.0  ;;  %v450_v35 = vmul.f32 %v370_v25, %v370_v25  ;;  %v218_v21 = vld [vmem:[#allocation5 + $0x34] sm:$0x1] }
  0x71   :  { %v126_v1 = vmul.f32 %v117_v18, %v91_v50  ;;  %v377_v43 = vsub.f32 %v217_v16, %v297_v19  ;;  %v219_v25 = vld [vmem:[#allocation5 + $0x35] sm:$0x1]  ;;  %v299_v26 = vld [vmem:[#allocation2 + $0x35] sm:$0x1]  ;;  %v220_v37 = vld [vmem:[#allocation5 + $0x36] sm:$0x1] }
  0x72   :  { %v557_v62 = vadd.f32 %v556_v34, %v555_v52  ;;  %v372_v34 = vsub.f32 %v212_v44, %v292_v33  ;;  %v294_v52 = vld [vmem:[#allocation2 + $0x30] sm:$0x1]  ;;  %v572_v56 = vsel %vm486_vm0, %v449_v40, 0.0  ;;  %v574_v0 = vsel %vm486_vm0, %v450_v35, 0.0 }
  0x73   :  { %v457_v41 = vmul.f32 %v377_v43, %v377_v43 }
  0x74   :  { %v559_v7 = vadd.f32 %v558_v27, %v557_v62  ;;  %v451_v27 = vmul.f32 %v371_v39, %v371_v39  ;;  %v374_v62 = vsub.f32 %v214_v51, %v294_v52  ;;  %v452_v63 = vmul.f32 %v372_v34, %v372_v34  ;;  %v300_v39 = vld [vmem:[#allocation2 + $0x36] sm:$0x1]  ;;  %v301_v34 = vld [vmem:[#allocation2 + $0x37] sm:$0x1] }
  0x75   :  { %v380_v50 = vsub.f32 %v220_v37, %v300_v39  ;;  %v308_v37 = vld [vmem:[#allocation2 + $0x3e] sm:$0x1] }
  0x76   :  { %v561_v10 = vadd.f32 %v560_v2, %v559_v7  ;;  %v216_v2 = vld [vmem:[#allocation5 + $0x32] sm:$0x1]  ;;  %v127_v7 = vmul.f32 %v124_v54, %v84_v13  ;;  %v454_v20 = vmul.f32 %v374_v62, %v374_v62  ;;  %v578_v42 = vsel %vm486_vm0, %v452_v63, 0.0  ;;  %v302_v54 = vld [vmem:[#allocation2 + $0x38] sm:$0x1] }
  0x77   :  { %v455_v13 = vmul.f32 %v375_v8, %v375_v8  ;;  %v460_v63 = vmul.f32 %v380_v50, %v380_v50 }
  0x78   :  { %v563_v24 = vadd.f32 %v562_v12, %v561_v10  ;;  %v576_v12 = vsel %vm486_vm0, %v451_v27, 0.0  ;;  %v376_v10 = vsub.f32 %v216_v2, %v296_v3  ;;  %vm918_vm1 = vcmp.gt.f32.partialorder %v126_v1, %v127_v7  ;;  %v224_v1 = vld [vmem:[#allocation5 + $0x3a] sm:$0x1]  ;;  %v304_v2 = vld [vmem:[#allocation2 + $0x3a] sm:$0x1] }
  0x79   :  { %v582_v33 = vsel %vm486_vm0, %v454_v20, 0.0  ;;  %v584_v45 = vsel %vm486_vm0, %v455_v13, 0.0  ;;  %v588_v27 = vsel %vm486_vm0, %v457_v41, 0.0  ;;  %v384_v19 = vsub.f32 %v224_v1, %v304_v2  ;;  %v309_v41 = vld [vmem:[#allocation2 + $0x3f] sm:$0x1] }
  0x7a   :  { %v565_v36 = vadd.f32 %v564_v22, %v563_v24  ;;  %v298_v22 = vld [vmem:[#allocation2 + $0x34] sm:$0x1]  ;;  %v580_v24 = vsel %vm486_vm0, %v453_v11, 0.0  ;;  %v456_v44 = vmul.f32 %v376_v10, %v376_v10  ;;  %v225_v11 = vld [vmem:[#allocation5 + $0x3b] sm:$0x1]  ;;  %v594_v10 = vsel %vm486_vm0, %v460_v63, 0.0 }
  0x7b   :  { %v378_v32 = vsub.f32 %v218_v21, %v298_v22  ;;  %v132_v20 = vsel %vm918_vm1, %v863_v5, %v847_v49  ;;  %v306_v21 = vld [vmem:[#allocation2 + $0x3c] sm:$0x1]  ;;  %v312_v2 = vld [vmem:[#allocation2 + $0x42] sm:$0x1] }
  0x7c   :  { %v567_v46 = vadd.f32 %v566_v29, %v565_v36  ;;  %v131_v36 = vsel %vm918_vm1, %v853_v58, %v832_v38  ;;  %v586_v52 = vsel %vm486_vm0, %v456_v44, 0.0  ;;  %v464_v44 = vmul.f32 %v384_v19, %v384_v19  ;;  %v232_v1 = vld [vmem:[#allocation5 + $0x42] sm:$0x1] }
  0x7d   :  { %v458_v51 = vmul.f32 %v378_v32, %v378_v32 }
  0x7e   :  { %v569_v53 = vadd.f32 %v568_v48, %v567_v46  ;;  %v379_v48 = vsub.f32 %v219_v25, %v299_v26  ;;  %v221_v46 = vld [vmem:[#allocation5 + $0x37] sm:$0x1]  ;;  %v307_v25 = vld [vmem:[#allocation2 + $0x3d] sm:$0x1]  ;;  %v602_v50 = vsel %vm486_vm0, %v464_v44, 0.0 }
  0x7f   :  { %v381_v38 = vsub.f32 %v221_v46, %v301_v34 }
  0x80   :  { %v571_v61 = vadd.f32 %v570_v47, %v569_v53  ;;  %v929_v47 = vmax.f32 %v131_v36, 0.0  ;;  %v222_v53 = vld [vmem:[#allocation5 + $0x38] sm:$0x1]  ;;  %v459_v58 = vmul.f32 %v379_v48, %v379_v48  ;;  %v228_v36 = vld [vmem:[#allocation5 + $0x3e] sm:$0x1] }
  0x81   :  { %v382_v62 = vsub.f32 %v222_v53, %v302_v54  ;;  %v461_v7 = vmul.f32 %v381_v38, %v381_v38  ;;  %v229_v48 = vld [vmem:[#allocation5 + $0x3f] sm:$0x1]  ;;  %v388_v34 = vsub.f32 %v228_v36, %v308_v37 }
  0x82   :  { %v573_v6 = vadd.f32 %v572_v56, %v571_v61  ;;  %v223_v56 = vld [vmem:[#allocation5 + $0x39] sm:$0x1]  ;;  %v935_v61 = vmul.f32 %v929_v47, %v819_v14  ;;  %v592_v8 = vsel %vm486_vm0, %v459_v58, 0.0 }
  0x83   :  { %v596_v13 = vsel %vm486_vm0, %v461_v7, 0.0 }
  0x84   :  { %v575_v9 = vadd.f32 %v574_v0, %v573_v6  ;;  %v590_v0 = vsel %vm486_vm0, %v458_v51, 0.0  ;;  %v383_v6 = vsub.f32 %v223_v56, %v303_v59  ;;  %678 = vrsqrt.f32 %v935_v61  ;;  %v230_v51 = vld [vmem:[#allocation5 + $0x40] sm:$0x1]  ;;  %v311_v56 = vld [vmem:[#allocation2 + $0x41] sm:$0x1] }
  0x85   :  { %vm141_vm2 = vcmp.eq.f32.partialorder %v935_v61, inf  ;;  %v144_v19 = vand.u32 2147483648, %v935_v61  ;;  %vm143_vm3 = vcmp.eq.f32.partialorder %v935_v61, 0.0 }
  0x86   :  { %v577_v23 = vadd.f32 %v576_v12, %v575_v9  ;;  %v305_v12 = vld [vmem:[#allocation2 + $0x3b] sm:$0x1]  ;;  %v462_v9 = vmul.f32 %v382_v62, %v382_v62  ;;  %v463_v43 = vmul.f32 %v383_v6, %v383_v6  ;;  %v468_v62 = vmul.f32 %v388_v34, %v388_v34 }
  0x88   :  { %v579_v29 = vadd.f32 %v578_v42, %v577_v23  ;;  %v226_v42 = vld [vmem:[#allocation5 + $0x3c] sm:$0x1]  ;;  %v385_v23 = vsub.f32 %v225_v11, %v305_v12  ;;  %v233_v11 = vld [vmem:[#allocation5 + $0x43] sm:$0x1]  ;;  %v313_v12 = vld [vmem:[#allocation2 + $0x43] sm:$0x1] }
  0x89   :  { %v386_v32 = vsub.f32 %v226_v42, %v306_v21  ;;  %v234_v21 = vld [vmem:[#allocation5 + $0x44] sm:$0x1] }
  0x8a   :  { %v581_v40 = vadd.f32 %v580_v24, %v579_v29  ;;  %v227_v24 = vld [vmem:[#allocation5 + $0x3d] sm:$0x1]  ;;  %v946_v29 = vmax.f32 %v132_v20, 0.0  ;;  %v465_v5 = vmul.f32 %v385_v23, %v385_v23  ;;  %v610_v20 = vsel %vm486_vm0, %v468_v62, 0.0 }
  0x8b   :  { %v387_v49 = vsub.f32 %v227_v24, %v307_v25  ;;  %v235_v25 = vld [vmem:[#allocation5 + $0x45] sm:$0x1] }
  0x8c   :  { %v583_v35 = vadd.f32 %v582_v33, %v581_v40  ;;  %v598_v33 = vsel %vm486_vm0, %v462_v9, 0.0  ;;  %v600_v40 = vsel %vm486_vm0, %v463_v43, 0.0  ;;  %v952_v46 = vmul.f32 %v946_v29, %v821_v15 }
  0x8d   :  { %v467_v38 = vmul.f32 %v387_v49, %v387_v49  ;;  %v604_v58 = vsel %vm486_vm0, %v465_v5, 0.0  ;;  %v392_v9 = vsub.f32 %v232_v1, %v312_v2  ;;  %v393_v43 = vsub.f32 %v233_v11, %v313_v12  ;;  %v316_v49 = vld [vmem:[#allocation2 + $0x46] sm:$0x1] }
  0x8e   :  { %v585_v55 = vadd.f32 %v584_v45, %v583_v35  ;;  %v466_v35 = vmul.f32 %v386_v32, %v386_v32  ;;  %v679_v54 = vpop.eup %678  ;;  %680 = vrsqrt.f32 %v952_v46  ;;  %vm153_vm4 = vcmp.eq.f32.partialorder %v952_v46, inf }
  0x8f   :  { %v472_v36 = vmul.f32 %v392_v9, %v392_v9  ;;  %v156_v2 = vand.u32 2147483648, %v952_v46  ;;  %vm155_vm5 = vcmp.eq.f32.partialorder %v952_v46, 0.0 }
  0x90   :  { %v587_v60 = vadd.f32 %v586_v52, %v585_v55  ;;  %v310_v52 = vld [vmem:[#allocation2 + $0x40] sm:$0x1]  ;;  %v389_v55 = vsub.f32 %v229_v48, %v309_v41  ;;  %v606_v63 = vsel %vm486_vm0, %v466_v35, 0.0  ;;  %v473_v48 = vmul.f32 %v393_v43, %v393_v43  ;;  %v237_v35 = vld [vmem:[#allocation5 + $0x47] sm:$0x1] }
  0x91   :  { %v242_v43 = vld [vmem:[#allocation5 + $0x4c] sm:$0x1] }
  0x92   :  { %v589_v3 = vadd.f32 %v588_v27, %v587_v60  ;;  %v231_v27 = vld [vmem:[#allocation5 + $0x41] sm:$0x1]  ;;  %v390_v60 = vsub.f32 %v230_v51, %v310_v52  ;;  %v469_v7 = vmul.f32 %v389_v55, %v389_v55 }
  0x93   :  { %v391_v6 = vsub.f32 %v231_v27, %v311_v56 }
  0x94   :  { %v591_v16 = vadd.f32 %v590_v0, %v589_v3  ;;  %v140_v0 = vmul.f32 %v679_v54, %v935_v61  ;;  %v612_v24 = vsel %vm486_vm0, %v469_v7, 0.0  ;;  %v618_v54 = vsel %vm486_vm0, %v472_v36, 0.0  ;;  %v323_v36 = vld [vmem:[#allocation2 + $0x4d] sm:$0x1] }
  0x96   :  { %v593_v22 = vadd.f32 %v592_v8, %v591_v16  ;;  %v608_v8 = vsel %vm486_vm0, %v467_v38, 0.0  ;;  %v142_v42 = vsel %vm141_vm2, %v935_v61, %v140_v0  ;;  %v238_v38 = vld [vmem:[#allocation5 + $0x48] sm:$0x1]  ;;  %v319_v0 = vld [vmem:[#allocation2 + $0x49] sm:$0x1] }
  0x97   :  { %v145_v44 = vsel %vm143_vm3, %v144_v19, %v142_v42 }
  0x98   :  { %v595_v26 = vadd.f32 %v594_v10, %v593_v22  ;;  %v470_v10 = vmul.f32 %v390_v60, %v390_v60  ;;  %v314_v22 = vld [vmem:[#allocation2 + $0x44] sm:$0x1]  ;;  %v146_v34 = vmul.f32 2.0, %v145_v44  ;;  %v620_v60 = vsel %vm486_vm0, %v473_v48, 0.0  ;;  %v244_v48 = vld [vmem:[#allocation5 + $0x4e] sm:$0x1] }
  0x9a   :  { %v597_v39 = vadd.f32 %v596_v13, %v595_v26  ;;  %v471_v13 = vmul.f32 %v391_v6, %v391_v6  ;;  %v315_v26 = vld [vmem:[#allocation2 + $0x45] sm:$0x1]  ;;  %v614_v37 = vsel %vm486_vm0, %v470_v10, 0.0 }
  0x9b   :  { %v395_v61 = vsub.f32 %v235_v25, %v315_v26  ;;  %v241_v10 = vld [vmem:[#allocation5 + $0x4b] sm:$0x1] }
  0x9c   :  { %v599_v45 = vadd.f32 %v598_v33, %v597_v39  ;;  %v394_v33 = vsub.f32 %v234_v21, %v314_v22  ;;  %v236_v39 = vld [vmem:[#allocation5 + $0x46] sm:$0x1]  ;;  %v616_v41 = vsel %vm486_vm0, %v471_v13, 0.0  ;;  %v322_v13 = vld [vmem:[#allocation2 + $0x4c] sm:$0x1] }
  0x9d   :  { %v396_v52 = vsub.f32 %v236_v39, %v316_v49  ;;  %v69_v39 = vld [vmem:[#allocation2 + $0x54] sm:$0x1]  ;;  %v402_v49 = vsub.f32 %v242_v43, %v322_v13 }
  0x9e   :  { %v601_v53 = vadd.f32 %v600_v40, %v599_v45  ;;  %v681_v40 = vpop.eup %680  ;;  %v137_v45 = vadd.f32 %v929_v47, %v819_v14  ;;  %v129_v14 = vsel %vm918_vm1, %v873_v17, %v851_v57  ;;  %v130_v47 = vsel %vm918_vm1, %v881_v28, %v861_v4  ;;  %v240_v57 = vld [vmem:[#allocation5 + $0x4a] sm:$0x1]  ;;  %v320_v17 = vld [vmem:[#allocation2 + $0x4a] sm:$0x1] }
  0x9f   :  { %v152_v55 = vmul.f32 %v681_v40, %v952_v46  ;;  %v476_v6 = vmul.f32 %v396_v52, %v396_v52  ;;  %v160_v12 = vsub.f32 %v827_v30, %v129_v14  ;;  %v162_v9 = vsub.f32 %v829_v31, %v130_v47  ;;  %v245_v52 = vld [vmem:[#allocation5 + $0x4f] sm:$0x1] }
  0xa0   :  { %v603_v59 = vadd.f32 %v602_v50, %v601_v53  ;;  %v317_v50 = vld [vmem:[#allocation2 + $0x47] sm:$0x1]  ;;  %v474_v53 = vmul.f32 %v394_v33, %v394_v33  ;;  %v147_v62 = vsub.f32 %v137_v45, %v146_v34  ;;  %v400_v22 = vsub.f32 %v240_v57, %v320_v17 }
  0xa1   :  { %v397_v56 = vsub.f32 %v237_v35, %v317_v50  ;;  %v161_v30 = vmul.f32 %v160_v12, %v160_v12  ;;  %v163_v31 = vmul.f32 %v162_v9, %v162_v9  ;;  %v243_v33 = vld [vmem:[#allocation5 + $0x4d] sm:$0x1] }
  0xa2   :  { %v605_v3 = vadd.f32 %v604_v58, %v603_v59  ;;  %v318_v58 = vld [vmem:[#allocation2 + $0x48] sm:$0x1]  ;;  %v475_v59 = vmul.f32 %v395_v61, %v395_v61  ;;  %v622_v7 = vsel %vm486_vm0, %v474_v53, 0.0  ;;  %v148_v19 = vadd.f32 %v147_v62, %v821_v15  ;;  %v102_v61 = vld [vmem:[#allocation2 + $0x59] sm:$0x1] }
  0xa3   :  { %v477_v28 = vmul.f32 %v397_v56, %v397_v56  ;;  %v403_v34 = vsub.f32 %v243_v33, %v323_v36  ;;  %v325_v53 = vld [vmem:[#allocation2 + $0x4f] sm:$0x1]  ;;  %v125_v18 = vmul.f32 %v102_v61, %v102_v61 }
  0xa4   :  { %v607_v16 = vadd.f32 %v606_v63, %v605_v3  ;;  %v239_v63 = vld [vmem:[#allocation5 + $0x49] sm:$0x1]  ;;  %v398_v3 = vsub.f32 %v238_v38, %v318_v58  ;;  %v149_v15 = vadd.f32 %v148_v19, %v946_v29  ;;  %v164_v29 = vadd.f32 %v163_v31, %v161_v30 }
  0xa5   :  { %v399_v4 = vsub.f32 %v239_v63, %v319_v0  ;;  %v482_v58 = vmul.f32 %v402_v49, %v402_v49  ;;  %v49_v0 = vld [vmem:[#allocation5 + $0x54] sm:$0x1] }
  0xa6   :  { %v609_v23 = vadd.f32 %v608_v8, %v607_v16  ;;  %v154_v8 = vsel %vm153_vm4, %v952_v46, %v152_v55  ;;  %v624_v16 = vsel %vm486_vm0, %v475_v59, 0.0  ;;  %v626_v46 = vsel %vm486_vm0, %v476_v6, 0.0 }
  0xa7   :  { %v157_v21 = vsel %vm155_vm5, %v156_v2, %v154_v8  ;;  %v479_v26 = vmul.f32 %v399_v4, %v399_v4  ;;  %v133_v55 = vsel %vm918_vm1, %v102_v61, %v69_v39  ;;  %v405_v59 = vsub.f32 %v245_v52, %v325_v53 }
  0xa8   :  { %v611_v32 = vadd.f32 %v610_v20, %v609_v23  ;;  %v321_v20 = vld [vmem:[#allocation2 + $0x4b] sm:$0x1]  ;;  %v478_v23 = vmul.f32 %v398_v3, %v398_v3  ;;  %v158_v44 = vmul.f32 2.0, %v157_v21  ;;  %v647_v63 = vsub.f32 1.0, %v133_v55 }
  0xa9   :  { %v401_v25 = vsub.f32 %v241_v10, %v321_v20  ;;  %v632_v50 = vsel %vm486_vm0, %v479_v26, 0.0  ;;  %v638_v2 = vsel %vm486_vm0, %v482_v58, 0.0  ;;  %v92_v6 = vmul.f32 %v69_v39, %v69_v39 }
  0xaa   :  { %v613_v5 = vadd.f32 %v612_v24, %v611_v32  ;;  %v628_v32 = vsel %vm486_vm0, %v477_v28, 0.0  ;;  %v630_v40 = vsel %vm486_vm0, %v478_v23, 0.0  ;;  %v652_v12 = vsub.f32 1.0, %v49_v0 }
  0xab   :  { %v481_v35 = vmul.f32 %v401_v25, %v401_v25  ;;  %v134_v19 = vadd.f32 %v125_v18, %v92_v6 }
  0xac   :  { %v615_v51 = vadd.f32 %v614_v37, %v613_v5  ;;  %v480_v5 = vmul.f32 %v400_v22, %v400_v22  ;;  %v653_v20 = vmul.f32 0.5, %v652_v12 }
  0xad   :  { %v636_v14 = vsel %vm486_vm0, %v481_v35, 0.0 }
  0xae   :  { %v617_v27 = vadd.f32 %v616_v41, %v615_v51  ;;  %v324_v41 = vld [vmem:[#allocation2 + $0x4e] sm:$0x1]  ;;  %v159_v51 = vsub.f32 %v149_v15, %v158_v44  ;;  %v654_v22 = vmul.f32 %v653_v20, %v134_v19 }
  0xaf   :  { %v404_v38 = vsub.f32 %v244_v48, %v324_v41 }
  0xb0   :  { %v619_v1 = vadd.f32 %v618_v54, %v617_v27  ;;  %v634_v27 = vsel %vm486_vm0, %v480_v5, 0.0  ;;  %v165_v47 = vadd.f32 %v164_v29, %v159_v51 }
  0xb2   :  { %v621_v11 = vadd.f32 %v620_v60, %v619_v1  ;;  %v483_v60 = vmul.f32 %v403_v34, %v403_v34  ;;  %v484_v1 = vmul.f32 %v404_v38, %v404_v38  ;;  %v646_v17 = vmul.f32 5.0, %v165_v47 }
  0xb4   :  { %v623_v42 = vadd.f32 %v622_v7, %v621_v11  ;;  %v485_v7 = vmul.f32 %v405_v59, %v405_v59  ;;  %v640_v8 = vsel %vm486_vm0, %v483_v60, 0.0  ;;  %v648_v11 = vmul.f32 %v647_v63, %v647_v63 }
  0xb5   :  { %v642_v4 = vsel %vm486_vm0, %v484_v1, 0.0 }
  0xb6   :  { %v625_v24 = vadd.f32 %v624_v16, %v623_v42  ;;  %v644_v16 = vsel %vm486_vm0, %v485_v7, 0.0  ;;  %v649_v10 = vadd.f32 %v648_v11, %v646_v17 }
  0xb8   :  { %v627_v37 = vadd.f32 %v626_v46, %v625_v24 }
  0xba   :  { %v629_v45 = vadd.f32 %v628_v32, %v627_v37 }
  0xbc   :  { %v631_v54 = vadd.f32 %v630_v40, %v629_v45 }
  0xbe   :  { %v633_v56 = vadd.f32 %v632_v50, %v631_v54 }
  0xc0   :  { %v635_v62 = vadd.f32 %v634_v27, %v633_v56 }
  0xc2   :  { %v637_v3 = vadd.f32 %v636_v14, %v635_v62 }
  0xc4   :  { %v639_v57 = vadd.f32 %v638_v2, %v637_v3 }
  0xc6   :  { %v641_v28 = vadd.f32 %v640_v8, %v639_v57 }
  0xc8   :  { %v643_v9 = vadd.f32 %v642_v4, %v641_v28 }
  0xca   :  { %v645_v42 = vadd.f32 %v644_v16, %v643_v9 }
  0xcc   :  { %v650_v21 = vadd.f32 %v649_v10, %v645_v42 }
  0xce   :  { %v651_v23 = vmul.f32 %v650_v21, %v49_v0 }
  0xd0   :  { %v655_v46 = vadd.f32 %v654_v22, %v651_v23 }
  0xd2   :  { %656 = vst [vmem:[#allocation7] sm:$0x1] %v655_v46 }
  0xd3   :  { %737 = shalt.err (!%p734_p6)
}
  0xd4   :  { %s738_s12 = scalar_lea.hbm %s1017_s2, 16 }
  0xd5   :  { %p739_p7 = scmp.ne.s32.totalorder %s1017_s2, %s738_s12  ;;  %p742_p8 = scmp.lt.u32.totalorder %s738_s12, %s1017_s2 }
  0xd7   :  { %p744_p9 = pnand %p742_p8, %p739_p7 }
  0xd9   :  { %747 = shalt.err (!%p744_p9)
}
  0xda   :  { %666 = dma.vmem_to_hbm [thread:$0]  %s664_s7, 16, %s1017_s2, [#allocation4]  }
  0xdb   :  { %752 = dma.done.wait [#allocation4], 16  }
  0xdc   :  { %753 = vsyncadd [#allocation4], 4294967280 }
  0xdd   :  { %670 = vsyncpa [#allocation3], 1 }
  0xde   :  { %671 = vsyncpa [#allocation6], 1 }
  0xdf   :  { %672 = vsyncpa [#allocation4], 1 }

</bundles_post_ra>
